<compile_context>
chip_gen: v7x
topology: tpu7x:2x2x1
jax: 0.10.0
libtpu: 0.0.40
codegen_flags: <defaults>
</compile_context>

<pallas_src>
import functools
import math

import jax
import jax.numpy as jnp
from jax import lax
from jax.experimental import pallas as pl
from jax.experimental.pallas import tpu as pltpu

_NEG_LARGE = -1e30     # finite "-inf": no NaN even before the first real score


# ----------------------------- per-chip defaults --------------------------------

def _device_kind():
    try:
        return jax.devices()[0].device_kind.lower()
    except Exception:
        return ""


_KIND = _device_kind()
_IS_V5E = ("v5e" in _KIND) or ("v5 lite" in _KIND) or ("v5litepod" in _KIND)


def _vmem_limit_bytes():
    cap = 0
    try:
        cap = int(pltpu.get_tpu_info().vmem_capacity_bytes)
    except Exception:
        cap = 0
    if cap <= 0:
        # Conservative fallback (v7x-sized) unless we positively identify a
        # 128 MiB-VMEM generation.
        cap = 128 * 1024 * 1024 if ("v5" in _KIND or "v6" in _KIND) else 64 * 1024 * 1024
    return min(cap * 3 // 4, 100 * 1024 * 1024)   # 48 MiB on v7x, 96 MiB on v5e/v6e


_VMEM_LIMIT = _vmem_limit_bytes()


def _pick_tile(n, target):
    """Largest divisor of n that is <= target."""
    t = min(n, target)
    while n % t:
        t -= 1
    return t


# --------------------------- tiled projection matmul ---------------------------

def _matmul_kernel(x_ref, w_ref, o_ref, acc_ref):
    # x_ref: (tm, tk); w_ref: (tk, tn) pre-transposed (MXU-native); o_ref: (tm, tn)
    @pl.when(pl.program_id(2) == 0)
    def _():
        acc_ref[...] = jnp.zeros(acc_ref.shape, acc_ref.dtype)

    acc_ref[...] += jnp.dot(x_ref[...], w_ref[...],
                            preferred_element_type=jnp.float32)

    @pl.when(pl.program_id(2) == pl.num_programs(2) - 1)
    def _():
        o_ref[...] = acc_ref[...].astype(o_ref.dtype)


def linear(x2d, w_t, *, tm=None, tn=None, tk=None):
    """x2d: (M, K); w_t: (K, N) pre-transposed weight; returns x2d @ w_t -> (M, N)."""
    M, K = x2d.shape
    K2, N = w_t.shape
    assert K == K2
    if tm is None:
        tm = 256 if _IS_V5E else 512
    if tn is None:
        tn = 128 if _IS_V5E else 256          # narrower N tiles on v5e (single vst slot)
    if tk is None:
        tk = 512
    tm, tn, tk = _pick_tile(M, tm), _pick_tile(N, tn), _pick_tile(K, tk)
    assert (tm % 8 == 0 or tm == M) and (tk % 128 == 0 or tk == K) \
        and (tn % 128 == 0 or tn == N), f"bad tiles {(tm, tn, tk)} for {(M, K, N)}"
    return pl.pallas_call(
        _matmul_kernel,
        out_shape=jax.ShapeDtypeStruct((M, N), x2d.dtype),
        grid=(M // tm, N // tn, K // tk),
        in_specs=[
            pl.BlockSpec((tm, tk), lambda i, j, k: (i, k)),
            pl.BlockSpec((tk, tn), lambda i, j, k: (k, j)),
        ],
        out_specs=pl.BlockSpec((tm, tn), lambda i, j, k: (i, j)),
        scratch_shapes=[pltpu.VMEM((tm, tn), jnp.float32)],
        compiler_params=pltpu.CompilerParams(
            dimension_semantics=("parallel", "parallel", "arbitrary"),
            vmem_limit_bytes=_VMEM_LIMIT),
    )(x2d, w_t)


# ----------------------------- RoPE pre-pass kernel ------------------------------
# One mem-bound pass over the q/k columns of the fused qkv tensor: rotates q
# (with 1/sqrt(head_dim) folded in) and k once, so the attention kernel is
# completely RoPE-free (no per-step cos/sin DMA, no per-kv-step rotation).

def _rope_kernel(q_ref, k_ref, cos_ref, sin_ref, qo_ref, ko_ref, *,
                 n_head, n_kv_head, head_dim, q_scale):
    half = head_dim // 2
    cos = cos_ref[...]
    sin = sin_ref[...]
    qcos = cos * q_scale
    qsin = sin * q_scale
    for h in range(n_head):
        d0 = h * head_dim
        xq = q_ref[:, d0:d0 + head_dim].astype(jnp.float32)
        qo_ref[:, d0:d0 + head_dim] = (
            xq * qcos + pltpu.roll(xq, half, axis=1) * qsin).astype(qo_ref.dtype)
    for h in range(n_kv_head):
        d0 = h * head_dim
        xk = k_ref[:, d0:d0 + head_dim].astype(jnp.float32)
        ko_ref[:, d0:d0 + head_dim] = (
            xk * cos + pltpu.roll(xk, half, axis=1) * sin).astype(ko_ref.dtype)


def apply_rope(qkv, cos, sin, *, n_head, n_kv_head, head_dim, block=256):
    B, S, total = qkv.shape
    dim = n_head * head_dim
    kv_size = n_kv_head * head_dim
    group = n_head // n_kv_head
    assert total == dim + 2 * kv_size
    block = _pick_tile(S, block)
    assert block % 8 == 0, f"rope block {block} not sublane aligned"
    kernel = functools.partial(
        _rope_kernel, n_head=n_head, n_kv_head=n_kv_head, head_dim=head_dim,
        q_scale=1.0 / math.sqrt(head_dim))
    return pl.pallas_call(
        kernel,
        out_shape=(jax.ShapeDtypeStruct((B, S, dim), qkv.dtype),
                   jax.ShapeDtypeStruct((B, S, kv_size), qkv.dtype)),
        grid=(B, S // block),
        in_specs=[
            pl.BlockSpec((None, block, dim), lambda b, i: (b, i, 0)),        # q cols
            pl.BlockSpec((None, block, kv_size), lambda b, i: (b, i, group)),  # k cols
            pl.BlockSpec((block, head_dim), lambda b, i: (i, 0)),            # cos
            pl.BlockSpec((block, head_dim), lambda b, i: (i, 0)),            # sin
        ],
        out_specs=(
            pl.BlockSpec((None, block, dim), lambda b, i: (b, i, 0)),
            pl.BlockSpec((None, block, kv_size), lambda b, i: (b, i, 0)),
        ),
        compiler_params=pltpu.CompilerParams(
            dimension_semantics=("parallel", "parallel"),
            vmem_limit_bytes=_VMEM_LIMIT),
    )(qkv, qkv, cos, sin)


# --------------------------- causal flash GQA attention --------------------------

def _flash_attn_kernel(qi_tbl, ki_tbl, q_ref, k_ref, v_ref, o_ref,
                       q_stack, m_sc, l_sc, acc_sc, *, group, head_dim, block):
    # q_ref: (block, group*head_dim) pre-rotated/pre-scaled q of this kv-head's group
    # k_ref/v_ref: (block, head_dim) for this kv head (k pre-rotated)
    # o_ref: (block, group*head_dim) lane-dense output slab
    t = pl.program_id(2)
    qi = qi_tbl[t]
    ki = ki_tbl[t]
    rows = group * block

    @pl.when(ki == 0)
    def _init():
        # Hoisted once per q row: stack the group's q heads into one MXU LHS.
        for g in range(group):
            q_stack[g * block:(g + 1) * block, :] = \
                q_ref[:, g * head_dim:(g + 1) * head_dim]
        m_sc[...] = jnp.full(m_sc.shape, _NEG_LARGE, m_sc.dtype)
        l_sc[...] = jnp.zeros(l_sc.shape, l_sc.dtype)
        acc_sc[...] = jnp.zeros(acc_sc.shape, acc_sc.dtype)

    def _update(masked):
        s = lax.dot_general(q_stack[...], k_ref[...], (((1,), (1,)), ((), ())),
                            preferred_element_type=jnp.float32)     # (rows, block)
        if masked:   # only the diagonal tile builds/applies the causal mask
            q_pos = lax.broadcasted_iota(jnp.int32, (rows, block), 0) % block
            k_pos = lax.broadcasted_iota(jnp.int32, (rows, block), 1)
            s = jnp.where(q_pos >= k_pos, s, _NEG_LARGE)
        m_prev = m_sc[...]
        m_new = jnp.maximum(m_prev, jnp.max(s, axis=-1, keepdims=True))
        alpha = jnp.exp(m_prev - m_new)
        p = jnp.exp(s - m_new)                                       # f32 statistics
        l_sc[...] = alpha * l_sc[...] + jnp.sum(p, axis=-1, keepdims=True)
        acc_sc[...] = alpha * acc_sc[...] + lax.dot_general(
            p.astype(v_ref.dtype), v_ref[...], (((1,), (0,)), ((), ())),
            preferred_element_type=jnp.float32)
        m_sc[...] = m_new

    @pl.when(ki < qi)
    def _off_diag():
        _update(masked=False)

    @pl.when(ki == qi)          # diagonal tile == last kv step of this row
    def _diag_and_finalize():
        _update(masked=True)
        inv_l = pl.reciprocal(l_sc[...], approx=True)   # EUP slot, off the VPU path
        out = acc_sc[...] * inv_l                       # (rows, head_dim) f32
        for g in range(group):
            o_ref[:, g * head_dim:(g + 1) * head_dim] = \
                out[g * block:(g + 1) * block, :].astype(o_ref.dtype)


def _triangular_tables(nblk):
    qs, ks = [], []
    for qi in range(nblk):
        for ki in range(qi + 1):
            qs.append(qi)
            ks.append(ki)
    return jnp.asarray(qs, jnp.int32), jnp.asarray(ks, jnp.int32)


def flash_gqa_attention(q_rot, k_rot, qkv, *, n_head, n_kv_head, head_dim, block=None):
    """q_rot: (B, S, n_head*head_dim) pre-rotated+scaled q;
    k_rot: (B, S, n_kv_head*head_dim) pre-rotated k;
    qkv:   (B, S, total) fused projection output (only its v columns are read).
    Returns (B, S, n_head*head_dim) causal GQA attention output."""
    B, S, dim = q_rot.shape
    kv_size = n_kv_head * head_dim
    group = n_head // n_kv_head
    total = qkv.shape[-1]
    assert dim == n_head * head_dim and n_head % n_kv_head == 0
    assert total == dim + 2 * kv_size
    assert head_dim % 128 == 0, "head_dim must be lane aligned (multiple of 128)"

    if block is None:
        block = 128 if _IS_V5E else 256      # 256-wide tiles feed the v6e/v7x MXU
    block = _pick_tile(S, block)
    assert S % block == 0 and block % 8 == 0, f"bad attention block {block} for S={S}"
    nblk = S // block
    rows = group * block

    qi_tbl, ki_tbl = _triangular_tables(nblk)   # only causal (qi, ki) pairs
    n_steps = int(qi_tbl.shape[0])

    kernel = functools.partial(_flash_attn_kernel, group=group,
                               head_dim=head_dim, block=block)

    def q_map(b, h, t, qi, ki):
        return (b, qi[t], h)

    def k_map(b, h, t, qi, ki):
        return (b, ki[t], h)

    def v_map(b, h, t, qi, ki):
        return (b, ki[t], n_head + n_kv_head + h)     # v columns of the fused qkv

    def o_map(b, h, t, qi, ki):
        return (b, qi[t], h)

    grid_spec = pltpu.PrefetchScalarGridSpec(
        num_scalar_prefetch=2,
        grid=(B, n_kv_head, n_steps),
        in_specs=[
            pl.BlockSpec((None, block, group * head_dim), q_map),
            pl.BlockSpec((None, block, head_dim), k_map),
            pl.BlockSpec((None, block, head_dim), v_map),
        ],
        out_specs=pl.BlockSpec((None, block, group * head_dim), o_map),
        scratch_shapes=[
            pltpu.VMEM((rows, head_dim), q_rot.dtype),    # stacked q (hoisted at ki==0)
            pltpu.VMEM((rows, 1), jnp.float32),           # running max m
            pltpu.VMEM((rows, 1), jnp.float32),           # running sum l
            pltpu.VMEM((rows, head_dim), jnp.float32),    # f32 accumulator
        ])

    return pl.pallas_call(
        kernel,
        out_shape=jax.ShapeDtypeStruct((B, S, dim), q_rot.dtype),
        grid_spec=grid_spec,
        compiler_params=pltpu.CompilerParams(
            dimension_semantics=("parallel", "parallel", "arbitrary"),
            vmem_limit_bytes=_VMEM_LIMIT),
    )(qi_tbl, ki_tbl, q_rot, k_rot, qkv)


# --------------------------- one-time model-init prep ---------------------------

def _rope_cos_sin(seqlen, head_dim, base=10000.0):
    freqs = 1.0 / (base ** (jnp.arange(0, head_dim, 2, dtype=jnp.float32) / head_dim))
    t = jnp.arange(seqlen, dtype=jnp.float32)
    ang = jnp.outer(t, freqs)                    # (S, D/2)
    return jnp.cos(ang), jnp.sin(ang)


def precompute_rope_tables(seqlen, head_dim, base=10000.0):
    """Half-split RoPE tables (cos duplicated, sin signed)."""
    cos, sin = _rope_cos_sin(seqlen, head_dim, base)
    return (jnp.concatenate([cos, cos], axis=-1),        # (S, D)
            jnp.concatenate([-sin, sin], axis=-1))       # (S, D)


def _deinterleave_rows(w, n_heads, head_dim):
    idx = jnp.arange(n_heads * head_dim).reshape(n_heads, head_dim // 2, 2)
    perm = jnp.concatenate([idx[..., 0], idx[..., 1]], axis=-1).reshape(-1)
    return w[perm]


def prepare_attention_params(wqkv, wo, *, n_head, n_local_heads, head_dim,
                             seqlen, rope_base=10000.0):
    """One-time (model init) prep: q/k output rows reordered from interleaved to
    split-half (q.k^T is invariant under the shared permutation, v untouched),
    weights transposed to (K, N) for the MXU-native matmul, RoPE tables built."""
    dim = n_head * head_dim
    kv_size = n_local_heads * head_dim
    wq = _deinterleave_rows(wqkv[:dim], n_head, head_dim)
    wk = _deinterleave_rows(wqkv[dim:dim + kv_size], n_local_heads, head_dim)
    wv = wqkv[dim + kv_size:]
    wqkv_prep = jnp.concatenate([wq, wk, wv], axis=0)
    cos, sin = precompute_rope_tables(seqlen, head_dim, rope_base)
    return dict(
        wqkv_t=jnp.asarray(wqkv_prep.T),     # (dim, total_head_dim)
        wo_t=jnp.asarray(wo.T),              # (dim, dim)
        rope_cos=cos, rope_sin=sin)


# --------------------------------- forward --------------------------------------

def attention_forward(x, params, *, n_head, n_local_heads, head_dim, block=None):
    """Mirrors Attention.forward with a causal BlockMask, kv_cache=None, input_pos=None."""
    B, S, dim = x.shape
    assert dim == n_head * head_dim
    qkv = linear(x.reshape(B * S, dim), params["wqkv_t"]).reshape(B, S, -1)
    q_rot, k_rot = apply_rope(qkv, params["rope_cos"], params["rope_sin"],
                              n_head=n_head, n_kv_head=n_local_heads,
                              head_dim=head_dim)
    y = flash_gqa_attention(q_rot, k_rot, qkv,
                            n_head=n_head, n_kv_head=n_local_heads,
                            head_dim=head_dim, block=block)
    # TODO(synk): kv_cache.update / input_pos decode path not implemented
    # (kv_cache is None for this module as constructed).
    return linear(y.reshape(B * S, dim), params["wo_t"]).reshape(B, S, dim)


# ------------------------- pure-JAX reference (for checking) --------------------

def _reference_attention(x, wqkv, wo, *, n_head, n_local_heads, head_dim):
    B, S, dim = x.shape
    kv_size = n_local_heads * head_dim
    cos, sin = _rope_cos_sin(S, head_dim)

    def rope_interleaved(t):
        b, s, h, d = t.shape
        ts = t.astype(jnp.float32).reshape(b, s, h, d // 2, 2)
        c = cos.reshape(1, s, 1, d // 2)
        si = sin.reshape(1, s, 1, d // 2)
        out = jnp.stack([ts[..., 0] * c - ts[..., 1] * si,
                         ts[..., 1] * c + ts[..., 0] * si], axis=-1)
        return out.reshape(b, s, h, d).astype(t.dtype)

    qkv = x @ wqkv.T
    q, k, v = jnp.split(qkv, [dim, dim + kv_size], axis=-1)
    q = rope_interleaved(q.reshape(B, S, n_head, head_dim))
    k = rope_interleaved(k.reshape(B, S, n_local_heads, head_dim))
    v = v.reshape(B, S, n_local_heads, head_dim)
    q, k, v = (jnp.swapaxes(t, 1, 2) for t in (q, k, v))
    group = n_head // n_local_heads
    k = jnp.repeat(k, group, axis=1)
    v = jnp.repeat(v, group, axis=1)
    s = jnp.einsum("bhqd,bhkd->bhqk", q, k) / math.sqrt(head_dim)
    causal = jnp.tril(jnp.ones((S, S), dtype=bool))
    s = jnp.where(causal, s, -jnp.inf)
    p = jax.nn.softmax(s, axis=-1)
    o = jnp.einsum("bhqk,bhkd->bhqd", p, v)
    o = jnp.swapaxes(o, 1, 2).reshape(B, S, dim)
    return o @ wo.T


# ----------------------------------- main ----------------------------------------

if __name__ == "__main__":
    # Small config consistent with ModelArgs: dim=256, n_head=2 -> head_dim=128,
    # n_local_heads=1 (GQA group of 2).  head_dim=128 matches real llama configs and
    # keeps every per-head slice 128-lane aligned.
    dim, n_head, n_local_heads = 256, 2, 1
    head_dim = dim // n_head
    total_head_dim = (n_head + 2 * n_local_heads) * head_dim     # 512
    bsz, seqlen = 2, 256

    key = jax.random.PRNGKey(0)
    kx, kq, ko = jax.random.split(key, 3)
    x_f32 = jax.random.normal(kx, (bsz, seqlen, dim), dtype=jnp.float32)
    wqkv_f32 = jax.random.normal(kq, (total_head_dim, dim), dtype=jnp.float32) * 0.02
    wo_f32 = jax.random.normal(ko, (dim, dim), dtype=jnp.float32) * 0.02

    # bf16 activations/weights end-to-end (MXU-native on v6e/v7x);
    # softmax stats / accumulators stay f32 inside the kernels.
    dtype = jnp.bfloat16
    x = x_f32.astype(dtype)
    wqkv = wqkv_f32.astype(dtype)
    wo = wo_f32.astype(dtype)

    params = prepare_attention_params(
        wqkv, wo, n_head=n_head, n_local_heads=n_local_heads,
        head_dim=head_dim, seqlen=seqlen)

    # Reference: f32 math applied to the same bf16-rounded inputs/weights.
    y_ref = _reference_attention(
        x.astype(jnp.float32), wqkv.astype(jnp.float32), wo.astype(jnp.float32),
        n_head=n_head, n_local_heads=n_local_heads, head_dim=head_dim)

    # block=128 exercises both the off-diagonal (unmasked) and diagonal (masked)
    # paths of the triangular grid; block=None uses the per-chip default.
    for blk in (128, None):
        y = attention_forward(x, params, n_head=n_head, n_local_heads=n_local_heads,
                              head_dim=head_dim, block=blk)
        jax.block_until_ready(y)
        assert y.shape == (bsz, seqlen, dim)
        err = float(jnp.max(jnp.abs(y.astype(jnp.float32) - y_ref)))
        assert jnp.allclose(y.astype(jnp.float32), y_ref, rtol=2e-2, atol=2e-2), \
            f"block={blk}: max abs err {err}"
    print("KERNEL_OK")
</pallas_src>

<mosaic_0001>
module attributes {stable_mosaic.version = 11 : i64} {
  func.func @_matmul_kernel(%arg0: i32, %arg1: i32, %arg2: i32, %arg3: memref<512x256xbf16, #tpu.memory_space<vmem>>, %arg4: memref<256x256xbf16, #tpu.memory_space<vmem>>, %arg5: memref<512x256xbf16, #tpu.memory_space<vmem>>, %arg6: memref<512x256xf32, #tpu.memory_space<vmem>>) attributes {dimension_semantics = [#tpu.dimension_semantics<parallel>, #tpu.dimension_semantics<parallel>, #tpu.dimension_semantics<arbitrary>], iteration_bounds = array<i64: 1, 2, 1>, scalar_prefetch = 0 : i64, scratch_operands = 1 : i64, tpu.core_type = #tpu.core_type<tc>, window_params = [{transform_indices = @transform_0, window_bounds = array<i64: 512, 256>}, {transform_indices = @transform_1, window_bounds = array<i64: 256, 256>}, {transform_indices = @transform_2, window_bounds = array<i64: 512, 256>}]} {
    %c0_i32 = arith.constant 0 : i32
    %0 = arith.cmpi eq, %arg2, %c0_i32 : i32
    %1 = arith.extui %0 : i1 to i32
    %c0_i32_0 = arith.constant 0 : i32
    %2 = arith.cmpi ne, %1, %c0_i32_0 : i32
    scf.if %2 {
      %cst_10 = arith.constant 0.000000e+00 : f32
      %12 = vector.broadcast %cst_10 : f32 to vector<512x256xf32>
      %c0_11 = arith.constant 0 : index
      %c0_12 = arith.constant 0 : index
      %13 = vector.load %arg6[%c0_11, %c0_12] : memref<512x256xf32, #tpu.memory_space<vmem>>, vector<512x256xf32>
      tpu.vector_store %arg6[%c0_11, %c0_12], %12 {strides = array<i32>} : memref<512x256xf32, #tpu.memory_space<vmem>>, vector<512x256xf32>,
    } else {
    }
    %c0 = arith.constant 0 : index
    %c0_1 = arith.constant 0 : index
    %3 = vector.load %arg6[%c0, %c0_1] : memref<512x256xf32, #tpu.memory_space<vmem>>, vector<512x256xf32>
    %c0_2 = arith.constant 0 : index
    %c0_3 = arith.constant 0 : index
    %4 = vector.load %arg3[%c0_2, %c0_3] : memref<512x256xbf16, #tpu.memory_space<vmem>>, vector<512x256xbf16>
    %c0_4 = arith.constant 0 : index
    %c0_5 = arith.constant 0 : index
    %5 = vector.load %arg4[%c0_4, %c0_5] : memref<256x256xbf16, #tpu.memory_space<vmem>>, vector<256x256xbf16>
    %cst = arith.constant dense<0.000000e+00> : vector<512x256xf32>
    %6 = tpu.matmul %4, %5, %cst {dimension_numbers = #tpu.dot_dimension_numbers<[1], [0], [0], [1], [0, 0, 1, 1], [], []>} : vector<512x256xbf16>, vector<256x256xbf16>, vector<512x256xf32> -> vector<512x256xf32>
    %7 = arith.addf %3, %6 : vector<512x256xf32>
    %c0_6 = arith.constant 0 : index
    %c0_7 = arith.constant 0 : index
    %8 = vector.load %arg6[%c0_6, %c0_7] : memref<512x256xf32, #tpu.memory_space<vmem>>, vector<512x256xf32>
    tpu.vector_store %arg6[%c0_6, %c0_7], %7 {strides = array<i32>} : memref<512x256xf32, #tpu.memory_space<vmem>>, vector<512x256xf32>,
    %c0_i32_8 = arith.constant 0 : i32
    %9 = arith.cmpi eq, %arg2, %c0_i32_8 : i32
    %10 = arith.extui %9 : i1 to i32
    %c0_i32_9 = arith.constant 0 : i32
    %11 = arith.cmpi ne, %10, %c0_i32_9 : i32
    scf.if %11 {
      %c0_10 = arith.constant 0 : index
      %c0_11 = arith.constant 0 : index
      %12 = vector.load %arg6[%c0_10, %c0_11] : memref<512x256xf32, #tpu.memory_space<vmem>>, vector<512x256xf32>
      %13 = arith.truncf %12 : vector<512x256xf32> to vector<512x256xbf16>
      %c0_12 = arith.constant 0 : index
      %c0_13 = arith.constant 0 : index
      %14 = vector.load %arg5[%c0_12, %c0_13] : memref<512x256xbf16, #tpu.memory_space<vmem>>, vector<512x256xbf16>
      tpu.vector_store %arg5[%c0_12, %c0_13], %13 {strides = array<i32>} : memref<512x256xbf16, #tpu.memory_space<vmem>>, vector<512x256xbf16>,
    } else {
    }
    return
  }
  func.func @transform_0(%arg0: i32, %arg1: i32, %arg2: i32) -> (i32, i32) {
    %c0_i32 = arith.constant 0 : i32
    return %arg0, %arg2 : i32, i32
  }
  func.func @transform_1(%arg0: i32, %arg1: i32, %arg2: i32) -> (i32, i32) {
    %c0_i32 = arith.constant 0 : i32
    return %arg2, %arg1 : i32, i32
  }
  func.func @transform_2(%arg0: i32, %arg1: i32, %arg2: i32) -> (i32, i32) {
    %c0_i32 = arith.constant 0 : i32
    return %arg0, %arg1 : i32, i32
  }
}

</mosaic_0001>

<bundles_post_ra>
// kernel: tpu_custom_call.1
= control target key start
LH: loop header
LB: loop body
LE: loop exit
PB: predicated region body
PF: predicated region fallthrough
CT: control target
= control target key end

     0   :  { %7 = vsyncpa [#allocation4], 0  ;;  %s3365_s0 = inlined_call_operand.hbm [shape: bf16[512,256], index: 0, kind: input, shape index: {}]   ;;  %s3366_s1 = inlined_call_operand.hbm [shape: bf16[256,512], index: 1, kind: input, shape index: {}]   ;;  %s3367_s2 = inlined_call_operand.hbm [shape: bf16[512,512], index: 2, kind: output, shape index: {}]  }
   0x1   :  { %8 = vsyncpa [#allocation7], 0 }
   0x2   :  { %10 = vsyncpa [#allocation7 + $0x1], 0 }
   0x3   :  { %11 = vsyncpa [#allocation5], 0 }
   0x4   :  { %13 = vsyncpa [#allocation5 + $0x1], 0  ;;  %s3038_s9 = smov 0   ;;  %s3040_s10 = smov 0  }
   0x5   :  { %s3042_s11 = smov 0   ;;  %s3044_s12 = smov 0  }
   0x6   :  { %s3046_s13 = smov 0   ;;  %s3048_s14 = smov 0  }
   0x7 LB: > { %s2370_s15 = sadd.s32 4294967295, %s3012_s14   ;;  %s2371_s16 = sadd.s32 4294967294, %s3012_s14   ;;  %s3012_s14 = sphi %s3048_s14, %s19_s14   ;;  %s3008_s13 = sphi %s3046_s13, %s3393_s13   ;;  %s3004_s12 = sphi %s3044_s12, %s3392_s12   ;;  %s3000_s11 = sphi %s3042_s11, %s3391_s11   ;;  %s2996_s10 = sphi %s3040_s10, %s3390_s10   ;;  %s2992_s9 = sphi %s3038_s9, %s3389_s9  }
   0x8   : > { %p82_p0 = scmp.ne.s32.totalorder %s3000_s11, %s2996_s10  ;;  %p83_p1 = scmp.eq.s32.totalorder %s3012_s14, 0 }
   0x9   : > { %p88_p2 = scmp.ne.s32.totalorder %s2996_s10, %s2992_s9  ;;  %p3075_p3 = scmp.eq.s32.totalorder %s2370_s15, 0 }
   0xa   : > { %p3079_p4 = por %p83_p1, %p82_p0  ;;  %p114_p5 = scmp.eq.s32.totalorder %s2370_s15, 1 }
   0xb   : > { %s3374_s17 = scalar_select %p3075_p3, 1, 0 }
   0xc   : > { %p3085_p6 = por %p3075_p3, %p88_p2  ;;  %p120_p7 = scmp.eq.s32.totalorder %s2371_s16, 1 }
   0xd   : > { %p3089_p8 = por %p114_p5, %p82_p0  ;;  %p2372_p9 = scmp.ge.s32.totalorder %s3012_s14, 1 }
   0xe   : > { %s3376_s19 = scalar_select %p3085_p6, 1, 0 }
   0xf   : > { %s3377_s20 = scalar_select %p3089_p8, 1, 0 }
  0x10   : > { %p3094_p10 = por %p120_p7, %p88_p2  ;;  %p127_p11 = scmp.lt.s32.totalorder %s3012_s14, 3 }
  0x11   : > { %s3014_s23 = smov [#allocation3]   ;;  %p2666_p1 = scmp.lt.s32.totalorder %s3012_s14, 2 }
  0x12   : > { %s3378_s21 = scalar_select %p3094_p10, 1, 0 }
  0x13   : > { %p3099_p12 = pnand %p2372_p9, %p127_p11  ;;  %s145_s24 = sshll.u32 %s3014_s23, 4  ;;  %s3103_s24 = int_to_ptr.vmem [resolvable:$true] %s145_s24 }
  0x14   : > { %p3117_p2 = pnand %p2666_p1, %p3079_p4  ;;  %s34_s27 = sadd.s32 1, %s3008_s13 }
  0x15   : > { %s3379_s22 = scalar_select %p3099_p12, 1, 0 }
  0x16   : > { %p2653_p13 = pneg %p3099_p12  ;;  %s2868_s30 = scalar_lea.hbm %s3365_s0, 8192 }
  0x17   : > { %s3381_s26 = scalar_select %p3117_p2, 1, 0 }
  0x18   : > { %p3111_p5 = pnand %p2653_p13, %p3075_p3  ;;  %p2869_p7 = scmp.ne.s32.totalorder %s3365_s0, %s2868_s30 }
  0x19   : > { %p2875_p4 = scmp.lt.u32.totalorder %s2868_s30, %s3365_s0 }
  0x1a   : > { %p2870_p9 = pneg %p3111_p5 }
  0x1c   : > { %p2871_p11 = pnand %p2870_p9, %p2869_p7 }
  0x1e   : > { %p2872_p13 = pneg %p2871_p11 }
  0x20   : > { %p2877_p1 = pnand %p2875_p4, %p2872_p13 }
  0x22   : > { %2880 = shalt.err (!%p2877_p1)
}
  0x23   : > { %s2881_s7 = scalar_lea.vmem %s3103_s24, 8192  ;;  %p2889_p6 = scmp.lt.s32.totalorder %s3103_s24, %s3103_s24 }
  0x24   : > { %p2882_p0 = scmp.ne.s32.totalorder %s3103_s24, %s2881_s7  ;;  %p2890_p3 = scmp.lt.s32.totalorder %s2881_s7, %s2881_s7 }
  0x26   : > { %p2884_p10 = pnand %p2882_p0, %p2870_p9  ;;  %p2891_p12 = por %p2890_p3, %p2889_p6 }
  0x28   : > { %p2885_p8 = pneg %p2884_p10 }
  0x2a   : > { %p2892_p2 = pnand %p2891_p12, %p2885_p8 }
  0x2c   : > { %2895 = shalt.err (!%p2892_p2)
}
  0x2d   : > { %s3015_s8 = smov 128   ;;  %s3016_s15 = smov 8  }
  0x2e   : > { %2656 = dma.hbm_to_vmem [thread:$0]  (!%p3111_p5), %s3365_s0, 8192, %s3103_s24, [#allocation4], %s3015_s8, %s3015_s8, %s3016_s15  }
  0x2f   : > { %p36_p3 = scmp.ge.s32.totalorder %s34_s27, 2  ;;  %s75_s23 = sadd.s32 1, %s3000_s11 }
  0x30   : > { %s159_s28 = sand.u32 1, %s3000_s11   ;;  %s2547_s3 = sshll.u32 %s3008_s13, 7 }
  0x31   : > { %s3395_s27 = smov (%p36_p3, %s34_s27), 0  ;;  %s2375_s29 = sshll.u32 %s159_s28, 8 }
  0x32   : > { %s71_s30 = ssub.s32 %s3008_s13, %s3395_s27  ;;  %s3156_s5 = scalar_lea.hbm %s3366_s1, %s2547_s3 }
  0x33   : > { %p73_p6 = scmp.eq.s32.totalorder %s71_s30, 0  ;;  %s163_s24 = scalar_lea.vmem [#allocation6], %s2375_s29 }
  0x34   : > { %s173_s6 = sshll.u32 %s163_s24, 4  ;;  %s3163_s16 = scalar_lea.sflag [#allocation7], %s159_s28  ;;  %s3161_s6 = int_to_ptr.vmem [resolvable:$true] %s173_s6 }
  0x35   : > { %s3159_s7 = scalar_select %p73_p6, %s3000_s11, %s75_s23  }
  0x36   : > { %s2896_s18 = scalar_lea.hbm %s3156_s5, 4096  ;;  %p3382_p10 = scmp.ne.s32.totalorder %s3381_s26, 0 }
  0x37   : > { %p2897_p8 = scmp.ne.s32.totalorder %s3156_s5, %s2896_s18  ;;  %s2901_s25 = scalar_lea.hbm %s3366_s1, 8192 }
  0x38   : > { %p2898_p12 = pneg %p3382_p10  ;;  %p2902_p2 = scmp.lt.u32.totalorder %s3156_s5, %s3366_s1 }
  0x39   : > { %p2903_p7 = scmp.lt.u32.totalorder %s2901_s25, %s2896_s18  ;;  %p2905_p11 = scmp.lt.u32.totalorder %s2896_s18, %s3156_s5 }
  0x3a   : > { %p2899_p0 = pnand %p2898_p12, %p2897_p8 }
  0x3b   : > { %p2904_p9 = por %p2903_p7, %p2902_p2 }
  0x3c   : > { %p2900_p5 = pneg %p2899_p0 }
  0x3d   : > { %p2906_p13 = por %p2905_p11, %p2904_p9 }
  0x3f   : > { %p2907_p4 = pnand %p2906_p13, %p2900_p5 }
  0x41   : > { %2910 = shalt.err (!%p2907_p4)
}
  0x42   : > { %s2911_s23 = scalar_lea.vmem %s3161_s6, 4096  ;;  %s3017_s28 = smov [#allocation6]  }
  0x43   : > { %p2912_p1 = scmp.ne.s32.totalorder %s3161_s6, %s2911_s23  ;;  %s2916_s24 = sshll.u32 %s3017_s28, 4  ;;  %s2917_s24 = int_to_ptr.vmem [resolvable:$false] %s2916_s24 }
  0x44   : > { %s2918_s30 = scalar_lea.vmem %s2917_s24, 8192  ;;  %p2919_p8 = scmp.lt.s32.totalorder %s3161_s6, %s2917_s24 }
  0x45   : > { %p2914_p3 = pnand %p2912_p1, %p2898_p12  ;;  %p2920_p0 = scmp.lt.s32.totalorder %s2918_s30, %s2911_s23 }
  0x47   : > { %p2915_p6 = pneg %p2914_p3  ;;  %p2921_p2 = por %p2920_p0, %p2919_p8 }
  0x49   : > { %p2922_p7 = pnand %p2921_p2, %p2915_p6 }
  0x4b   : > { %2925 = shalt.err (!%p2922_p7)
}
  0x4c   : > { %s3018_s18 = smov 256   ;;  %p3383_p12 = scmp.ne.s32.totalorder %s3379_s22, 0 }
  0x4d   : > { %2660 = dma.hbm_to_vmem [thread:$0]  (!%p3382_p10), %s3156_s5, 4096, %s3161_s6, %s3163_s16, %s3018_s18, %s3015_s8, %s3016_s15  }
  0x4e   : > { %185 = sbr.rel (%p3383_p12) target bundleno = 508 (0x1fc), region = 28  ;;  %p3384_p5 = scmp.ne.s32.totalorder (!%p3383_p12), %s3374_s17, 0 }
  0x55   : > { %2979 = dma.done.wait (%p3384_p5), [#allocation4], 8192  }
  0x56   : > { %2981 = vsyncadd (%p3384_p5), [#allocation4], 4294959104  ;;  %s3200_s3 = sand.u32 1, %s2996_s10   ;;  %p3385_p10 = scmp.ne.s32.totalorder %s3376_s19, 0 }
  0x57   : > { %s2380_s26 = sshll.u32 %s3200_s3, 8  ;;  %s192_s25 = scalar_lea.sflag [#allocation7], %s3200_s3 }
  0x58   : > { %s3204_s29 = scalar_lea.vmem [#allocation6], %s2380_s26 }
  0x59   : > { %2983 = dma.done.wait (%p3385_p10), %s192_s25, 4096  }
  0x5a   : > { %2985 = vsyncadd (%p3385_p10), %s192_s25, 4294963200  ;;  %v2724_v0 = vld [vmem:[%s3204_s29 + $0x4] ss:$8 sps:$4 sm:$0xff]   ;;  %v2726_v1 = vld [vmem:[%s3204_s29] ss:$8 sps:$4 sm:$0xff]   ;;  %s2381_s17 = sshll.u32 %s3200_s3, 9 }
  0x5b   : > { %1058 = vmatprep.subr.bf16.mxu0 %v2724_v0  ;;  %2613 = vmatprep.subr.bf16.mxu1 %v2724_v0  ;;  %v2727_v2 = vld [vmem:[%s3204_s29 + $0x14] ss:$8 sps:$4 sm:$0xff]   ;;  %v2729_v3 = vld [vmem:[%s3204_s29 + $0x10] ss:$8 sps:$4 sm:$0xff]   ;;  %v2730_v4 = vld [vmem:[%s3204_s29 + $0x24] ss:$8 sps:$4 sm:$0xff]  }
  0x5c   : > { %1059 = vmatpush1.bf16.msra.mxu0 %v2726_v1  ;;  %2629 = vmatpush1.bf16.msra.mxu1 %v2726_v1  ;;  %v2732_v5 = vld [vmem:[%s3204_s29 + $0x20] ss:$8 sps:$4 sm:$0xff]   ;;  %v2733_v6 = vld [vmem:[%s3204_s29 + $0x34] ss:$8 sps:$4 sm:$0xff]   ;;  %v2735_v7 = vld [vmem:[%s3204_s29 + $0x30] ss:$8 sps:$4 sm:$0xff]  }
  0x5d   : > { %1060 = vmatprep.subr.bf16.mxu0 %v2727_v2  ;;  %2614 = vmatprep.subr.bf16.mxu1 %v2727_v2  ;;  %v2736_v8 = vld [vmem:[%s3204_s29 + $0x44] ss:$8 sps:$4 sm:$0xff]   ;;  %v2738_v9 = vld [vmem:[%s3204_s29 + $0x40] ss:$8 sps:$4 sm:$0xff]   ;;  %v2739_v10 = vld [vmem:[%s3204_s29 + $0x54] ss:$8 sps:$4 sm:$0xff]  }
  0x5e   : > { %v2741_v11 = vld [vmem:[%s3204_s29 + $0x50] ss:$8 sps:$4 sm:$0xff]   ;;  %v2742_v12 = vld [vmem:[%s3204_s29 + $0x64] ss:$8 sps:$4 sm:$0xff]   ;;  %v2744_v14 = vld [vmem:[%s3204_s29 + $0x60] ss:$8 sps:$4 sm:$0xff]  }
  0x5f   : > { %v2774_v13 = vld [vmem:[#allocation3 + $0x4] ss:$8 sps:$4 sm:$0xff]   ;;  %v2745_v16 = vld [vmem:[%s3204_s29 + $0x74] ss:$8 sps:$4 sm:$0xff]   ;;  %v2747_v17 = vld [vmem:[%s3204_s29 + $0x70] ss:$8 sps:$4 sm:$0xff]  }
  0x60   : > { %1061 = vmatpush1.bf16.msra.mxu0 %v2729_v3  ;;  %2630 = vmatpush1.bf16.msra.mxu1 %v2729_v3  ;;  %v2777_v15 = vld [vmem:[#allocation3 + $0x104] ss:$8 sps:$4 sm:$0xff]   ;;  %v2750_v19 = vld [vmem:[%s3204_s29 + $0x80] ss:$8 sps:$4 sm:$0xff]   ;;  %v2751_v20 = vld [vmem:[%s3204_s29 + $0x94] ss:$8 sps:$4 sm:$0xff]  }
  0x61   : > { %1062 = vmatprep.subr.bf16.mxu0 %v2730_v4  ;;  %2615 = vmatprep.subr.bf16.mxu1 %v2730_v4  ;;  %v2748_v18 = vld [vmem:[%s3204_s29 + $0x84] ss:$8 sps:$4 sm:$0xff]   ;;  %v2753_v21 = vld [vmem:[%s3204_s29 + $0x90] ss:$8 sps:$4 sm:$0xff]   ;;  %v2756_v23 = vld [vmem:[%s3204_s29 + $0xa0] ss:$8 sps:$4 sm:$0xff]  }
  0x62   : > { %1090 = vmatprep.mubr.bf16.mxu0 %v2774_v13  ;;  %1250 = vmatprep.mubr.bf16.mxu1 %v2777_v15  ;;  %v2754_v22 = vld [vmem:[%s3204_s29 + $0xa4] ss:$8 sps:$4 sm:$0xff]   ;;  %v2757_v24 = vld [vmem:[%s3204_s29 + $0xb4] ss:$8 sps:$4 sm:$0xff]   ;;  %v2759_v25 = vld [vmem:[%s3204_s29 + $0xb0] ss:$8 sps:$4 sm:$0xff]  }
  0x63   : > { %v2760_v26 = vld [vmem:[%s3204_s29 + $0xc4] ss:$8 sps:$4 sm:$0xff]   ;;  %v2762_v27 = vld [vmem:[%s3204_s29 + $0xc0] ss:$8 sps:$4 sm:$0xff]   ;;  %v2763_v28 = vld [vmem:[%s3204_s29 + $0xd4] ss:$8 sps:$4 sm:$0xff]  }
  0x64   : > { %1063 = vmatpush1.bf16.msra.mxu0 %v2732_v5  ;;  %2631 = vmatpush1.bf16.msra.mxu1 %v2732_v5  ;;  %v2765_v29 = vld [vmem:[%s3204_s29 + $0xd0] ss:$8 sps:$4 sm:$0xff]   ;;  %v2766_v30 = vld [vmem:[%s3204_s29 + $0xe4] ss:$8 sps:$4 sm:$0xff]   ;;  %v2768_v31 = vld [vmem:[%s3204_s29 + $0xe0] ss:$8 sps:$4 sm:$0xff]  }
  0x65   : > { %1064 = vmatprep.subr.bf16.mxu0 %v2733_v6  ;;  %2616 = vmatprep.subr.bf16.mxu1 %v2733_v6  ;;  %v2769_v32 = vld [vmem:[%s3204_s29 + $0xf4] ss:$8 sps:$4 sm:$0xff]   ;;  %v2771_v33 = vld [vmem:[%s3204_s29 + $0xf0] ss:$8 sps:$4 sm:$0xff]   ;;  %v2772_v34 = vld [vmem:[#allocation3] ss:$8 sps:$4 sm:$0xff]  }
  0x66   : > { %v2775_v35 = vld [vmem:[#allocation3 + $0x100] ss:$8 sps:$4 sm:$0xff]   ;;  %v2778_v36 = vld [vmem:[#allocation3 + $0x14] ss:$8 sps:$4 sm:$0xff]   ;;  %v2782_v38 = vld [vmem:[#allocation3 + $0x10] ss:$8 sps:$4 sm:$0xff]  }
  0x67   : > { %v2780_v37 = vld [vmem:[#allocation3 + $0x114] ss:$8 sps:$4 sm:$0xff]   ;;  %v2783_v39 = vld [vmem:[#allocation3 + $0x110] ss:$8 sps:$4 sm:$0xff]   ;;  %v2784_v40 = vld [vmem:[#allocation3 + $0x24] ss:$8 sps:$4 sm:$0xff]  }
  0x68   : > { %1065 = vmatpush1.bf16.msra.mxu0 %v2735_v7  ;;  %2632 = vmatpush1.bf16.msra.mxu1 %v2735_v7  ;;  %v2786_v41 = vld [vmem:[#allocation3 + $0x124] ss:$8 sps:$4 sm:$0xff]   ;;  %v2788_v42 = vld [vmem:[#allocation3 + $0x20] ss:$8 sps:$4 sm:$0xff]   ;;  %v2790_v44 = vld [vmem:[#allocation3 + $0x34] ss:$8 sps:$4 sm:$0xff]  }
  0x69   : > { %1066 = vmatprep.subr.bf16.mxu0 %v2736_v8  ;;  %2617 = vmatprep.subr.bf16.mxu1 %v2736_v8  ;;  %v2789_v43 = vld [vmem:[#allocation3 + $0x120] ss:$8 sps:$4 sm:$0xff]   ;;  %v2792_v45 = vld [vmem:[#allocation3 + $0x134] ss:$8 sps:$4 sm:$0xff]   ;;  %v2794_v46 = vld [vmem:[#allocation3 + $0x30] ss:$8 sps:$4 sm:$0xff]  }
  0x6a   : > { %v2795_v47 = vld [vmem:[#allocation3 + $0x130] ss:$8 sps:$4 sm:$0xff]   ;;  %v2796_v48 = vld [vmem:[#allocation3 + $0x44] ss:$8 sps:$4 sm:$0xff]   ;;  %v2800_v50 = vld [vmem:[#allocation3 + $0x40] ss:$8 sps:$4 sm:$0xff]  }
  0x6b   : > { %v2798_v49 = vld [vmem:[#allocation3 + $0x144] ss:$8 sps:$4 sm:$0xff]   ;;  %v2801_v51 = vld [vmem:[#allocation3 + $0x140] ss:$8 sps:$4 sm:$0xff]   ;;  %v2802_v52 = vld [vmem:[#allocation3 + $0x54] ss:$8 sps:$4 sm:$0xff]  }
  0x6c   : > { %1067 = vmatpush1.bf16.msra.mxu0 %v2738_v9  ;;  %2633 = vmatpush1.bf16.msra.mxu1 %v2738_v9  ;;  %v2804_v53 = vld [vmem:[#allocation3 + $0x154] ss:$8 sps:$4 sm:$0xff]   ;;  %v2806_v54 = vld [vmem:[#allocation3 + $0x50] ss:$8 sps:$4 sm:$0xff]   ;;  %v2808_v56 = vld [vmem:[#allocation3 + $0x64] ss:$8 sps:$4 sm:$0xff]  }
  0x6d   : > { %1068 = vmatprep.subr.bf16.mxu0 %v2739_v10  ;;  %2618 = vmatprep.subr.bf16.mxu1 %v2739_v10  ;;  %v2807_v55 = vld [vmem:[#allocation3 + $0x150] ss:$8 sps:$4 sm:$0xff]   ;;  %v2810_v57 = vld [vmem:[#allocation3 + $0x164] ss:$8 sps:$4 sm:$0xff]   ;;  %v2812_v58 = vld [vmem:[#allocation3 + $0x60] ss:$8 sps:$4 sm:$0xff]  }
  0x6e   : > { %v2813_v59 = vld [vmem:[#allocation3 + $0x160] ss:$8 sps:$4 sm:$0xff]   ;;  %v2814_v60 = vld [vmem:[#allocation3 + $0x74] ss:$8 sps:$4 sm:$0xff]   ;;  %v2818_v62 = vld [vmem:[#allocation3 + $0x70] ss:$8 sps:$4 sm:$0xff]  }
  0x6f   : > { %v2816_v61 = vld [vmem:[#allocation3 + $0x174] ss:$8 sps:$4 sm:$0xff]   ;;  %v2819_v63 = vld [vmem:[#allocation3 + $0x170] ss:$8 sps:$4 sm:$0xff]   ;;  %v2820_v0 = vld [vmem:[#allocation3 + $0x84] ss:$8 sps:$4 sm:$0xff]  }
  0x70   : > { %1069 = vmatpush1.bf16.msra.mxu0 %v2741_v11  ;;  %2634 = vmatpush1.bf16.msra.mxu1 %v2741_v11  ;;  %v2822_v1 = vld [vmem:[#allocation3 + $0x184] ss:$8 sps:$4 sm:$0xff]   ;;  %v2824_v2 = vld [vmem:[#allocation3 + $0x80] ss:$8 sps:$4 sm:$0xff]   ;;  %v2826_v4 = vld [vmem:[#allocation3 + $0x94] ss:$8 sps:$4 sm:$0xff]  }
  0x71   : > { %1070 = vmatprep.subr.bf16.mxu0 %v2742_v12  ;;  %2619 = vmatprep.subr.bf16.mxu1 %v2742_v12  ;;  %v2825_v3 = vld [vmem:[#allocation3 + $0x180] ss:$8 sps:$4 sm:$0xff]   ;;  %v2828_v5 = vld [vmem:[#allocation3 + $0x194] ss:$8 sps:$4 sm:$0xff]   ;;  %v2830_v6 = vld [vmem:[#allocation3 + $0x90] ss:$8 sps:$4 sm:$0xff]  }
  0x72   : > { %v2831_v7 = vld [vmem:[#allocation3 + $0x190] ss:$8 sps:$4 sm:$0xff]   ;;  %v2832_v8 = vld [vmem:[#allocation3 + $0xa4] ss:$8 sps:$4 sm:$0xff]   ;;  %v2836_v10 = vld [vmem:[#allocation3 + $0xa0] ss:$8 sps:$4 sm:$0xff]  }
  0x73   : > { %v2834_v9 = vld [vmem:[#allocation3 + $0x1a4] ss:$8 sps:$4 sm:$0xff]   ;;  %v2837_v11 = vld [vmem:[#allocation3 + $0x1a0] ss:$8 sps:$4 sm:$0xff]   ;;  %v2838_v12 = vld [vmem:[#allocation3 + $0xb4] ss:$8 sps:$4 sm:$0xff]  }
  0x74   : > { %1071 = vmatpush1.bf16.msra.mxu0 %v2744_v14  ;;  %2635 = vmatpush1.bf16.msra.mxu1 %v2744_v14  ;;  %v2840_v13 = vld [vmem:[#allocation3 + $0x1b4] ss:$8 sps:$4 sm:$0xff]   ;;  %v2842_v14 = vld [vmem:[#allocation3 + $0xb0] ss:$8 sps:$4 sm:$0xff]   ;;  %s3243_s19 = scalar_lea.vmem [#allocation8], %s2381_s17  ;;  %s2612_s22 = sshll.u32 %s3004_s12, 7 }
  0x75   : > { %1072 = vmatprep.subr.bf16.mxu0 %v2745_v16  ;;  %2620 = vmatprep.subr.bf16.mxu1 %v2745_v16  ;;  %v2843_v15 = vld [vmem:[#allocation3 + $0x1b0] ss:$8 sps:$4 sm:$0xff]   ;;  %v2844_v16 = vld [vmem:[#allocation3 + $0xc4] ss:$8 sps:$4 sm:$0xff]   ;;  %s2263_s8 = sshll.u32 %s3243_s19, 4  ;;  %s3310_s6 = scalar_lea.hbm %s3367_s2, %s2612_s22  ;;  %s3312_s8 = int_to_ptr.vmem [resolvable:$true] %s2263_s8 }
  0x76   : > { %s2247_s12 = scalar_lea.sflag [#allocation5], %s3200_s3  ;;  %s2926_s16 = scalar_lea.vmem %s3312_s8, 8192 }
  0x77   : > { %p2927_p9 = scmp.ne.s32.totalorder %s3312_s8, %s2926_s16  ;;  %p3386_p11 = scmp.ne.s32.totalorder %s3377_s20, 0 }
  0x78   : > { %1073 = vmatpush1.bf16.msra.mxu0 %v2747_v17  ;;  %2636 = vmatpush1.bf16.msra.mxu1 %v2747_v17  ;;  %v2846_v17 = vld [vmem:[#allocation3 + $0x1c4] ss:$8 sps:$4 sm:$0xff]   ;;  %s3019_s4 = smov [#allocation8]  }
  0x79   : > { %1074 = vmatprep.subr.bf16.mxu0 %v2748_v18  ;;  %2621 = vmatprep.subr.bf16.mxu1 %v2748_v18  ;;  %v2848_v18 = vld [vmem:[#allocation3 + $0xc0] ss:$8 sps:$4 sm:$0xff]   ;;  %p2928_p13 = pnand %p2927_p9, %p3386_p11  ;;  %s2930_s23 = sshll.u32 %s3019_s4, 4  ;;  %s2931_s23 = int_to_ptr.vmem [resolvable:$false] %s2930_s23 }
  0x7a   : > { %s2932_s28 = scalar_lea.vmem %s2931_s23, 16384  ;;  %p2933_p1 = scmp.lt.s32.totalorder %s3312_s8, %s2931_s23 }
  0x7b   : > { %p2929_p4 = pneg %p2928_p13  ;;  %p2934_p3 = scmp.lt.s32.totalorder %s2932_s28, %s2926_s16 }
  0x7c   : > { %1075 = vmatpush1.bf16.msra.mxu0 %v2750_v19  ;;  %2637 = vmatpush1.bf16.msra.mxu1 %v2750_v19  ;;  %v2849_v19 = vld [vmem:[#allocation3 + $0x1c0] ss:$8 sps:$4 sm:$0xff]  }
  0x7d   : > { %1076 = vmatprep.subr.bf16.mxu0 %v2751_v20  ;;  %2622 = vmatprep.subr.bf16.mxu1 %v2751_v20  ;;  %v2850_v20 = vld [vmem:[#allocation3 + $0xd4] ss:$8 sps:$4 sm:$0xff]   ;;  %p2935_p6 = por %p2934_p3, %p2933_p1 }
  0x7f   : > { %p2936_p8 = pnand %p2935_p6, %p2929_p4 }
  0x80   : > { %1077 = vmatpush1.bf16.msra.mxu0 %v2753_v21  ;;  %2638 = vmatpush1.bf16.msra.mxu1 %v2753_v21  ;;  %v2852_v21 = vld [vmem:[#allocation3 + $0x1d4] ss:$8 sps:$4 sm:$0xff]  }
  0x81   : > { %1078 = vmatprep.subr.bf16.mxu0 %v2754_v22  ;;  %2623 = vmatprep.subr.bf16.mxu1 %v2754_v22  ;;  %v2854_v22 = vld [vmem:[#allocation3 + $0xd0] ss:$8 sps:$4 sm:$0xff]  }
  0x84   : > { %1079 = vmatpush1.bf16.msra.mxu0 %v2756_v23  ;;  %2639 = vmatpush1.bf16.msra.mxu1 %v2756_v23  ;;  %v2855_v23 = vld [vmem:[#allocation3 + $0x1d0] ss:$8 sps:$4 sm:$0xff]  }
  0x85   : > { %1080 = vmatprep.subr.bf16.mxu0 %v2757_v24  ;;  %2624 = vmatprep.subr.bf16.mxu1 %v2757_v24  ;;  %v2856_v24 = vld [vmem:[#allocation3 + $0xe4] ss:$8 sps:$4 sm:$0xff]  }
  0x88   : > { %1081 = vmatpush1.bf16.msra.mxu0 %v2759_v25  ;;  %2640 = vmatpush1.bf16.msra.mxu1 %v2759_v25  ;;  %v2858_v25 = vld [vmem:[#allocation3 + $0x1e4] ss:$8 sps:$4 sm:$0xff]  }
  0x89   : > { %1082 = vmatprep.subr.bf16.mxu0 %v2760_v26  ;;  %2625 = vmatprep.subr.bf16.mxu1 %v2760_v26  ;;  %v2860_v26 = vld [vmem:[#allocation3 + $0xe0] ss:$8 sps:$4 sm:$0xff]  }
  0x8c   : > { %1083 = vmatpush1.bf16.msra.mxu0 %v2762_v27  ;;  %2641 = vmatpush1.bf16.msra.mxu1 %v2762_v27  ;;  %v2861_v27 = vld [vmem:[#allocation3 + $0x1e0] ss:$8 sps:$4 sm:$0xff]  }
  0x8d   : > { %1084 = vmatprep.subr.bf16.mxu0 %v2763_v28  ;;  %2626 = vmatprep.subr.bf16.mxu1 %v2763_v28  ;;  %v2862_v28 = vld [vmem:[#allocation3 + $0xf4] ss:$8 sps:$4 sm:$0xff]  }
  0x90   : > { %1085 = vmatpush1.bf16.msra.mxu0 %v2765_v29  ;;  %2642 = vmatpush1.bf16.msra.mxu1 %v2765_v29  ;;  %v2864_v29 = vld [vmem:[#allocation3 + $0x1f4] ss:$8 sps:$4 sm:$0xff]  }
  0x91   : > { %1086 = vmatprep.subr.bf16.mxu0 %v2766_v30  ;;  %2627 = vmatprep.subr.bf16.mxu1 %v2766_v30  ;;  %v2866_v30 = vld [vmem:[#allocation3 + $0xf0] ss:$8 sps:$4 sm:$0xff]  }
  0x94   : > { %1087 = vmatpush1.bf16.msra.mxu0 %v2768_v31  ;;  %2643 = vmatpush1.bf16.msra.mxu1 %v2768_v31  ;;  %v2867_v31 = vld [vmem:[#allocation3 + $0x1f0] ss:$8 sps:$4 sm:$0xff]  }
  0x95   : > { %1088 = vmatprep.subr.bf16.mxu0 %v2769_v32  ;;  %2628 = vmatprep.subr.bf16.mxu1 %v2769_v32 }
  0x98   : > { %1089 = vmatpush1.bf16.msra.mxu0 %v2771_v33  ;;  %2644 = vmatpush1.bf16.msra.mxu1 %v2771_v33 }
  0x9b   : > { %1091 = vmatmul.mubr.bf16.vlgmr.msra.gmra.mrb[0].mxu0 %v2772_v34  ;;  %1251 = vmatmul.mubr.bf16.vlgmr.msra.gmra.mrb[0].mxu1 %v2775_v35 }
  0x9c   : > { %1100 = vmatprep.mubr.bf16.mxu0 %v2778_v36  ;;  %1260 = vmatprep.mubr.bf16.mxu1 %v2780_v37 }
  0xa3   : > { %1101 = vmatmul.mubr.bf16.gmra.mrb[4].mxu0 %v2782_v38  ;;  %1261 = vmatmul.mubr.bf16.gmra.mrb[4].mxu1 %v2783_v39 }
  0xa4   : > { %1110 = vmatprep.mubr.bf16.mxu0 %v2784_v40  ;;  %1270 = vmatprep.mubr.bf16.mxu1 %v2786_v41 }
  0xab   : > { %1111 = vmatmul.mubr.bf16.gmra.mrb[8].mxu0 %v2788_v42  ;;  %1271 = vmatmul.mubr.bf16.gmra.mrb[8].mxu1 %v2789_v43 }
  0xac   : > { %1120 = vmatprep.mubr.bf16.mxu0 %v2790_v44  ;;  %1280 = vmatprep.mubr.bf16.mxu1 %v2792_v45 }
  0xb3   : > { %1121 = vmatmul.mubr.bf16.gmra.mrb[12].mxu0 %v2794_v46  ;;  %1281 = vmatmul.mubr.bf16.gmra.mrb[12].mxu1 %v2795_v47 }
  0xb4   : > { %1130 = vmatprep.mubr.bf16.mxu0 %v2796_v48  ;;  %1290 = vmatprep.mubr.bf16.mxu1 %v2798_v49 }
  0xbb   : > { %1131 = vmatmul.mubr.bf16.gmra.mrb[16].mxu0 %v2800_v50  ;;  %1291 = vmatmul.mubr.bf16.gmra.mrb[16].mxu1 %v2801_v51 }
  0xbc   : > { %1140 = vmatprep.mubr.bf16.mxu0 %v2802_v52  ;;  %1300 = vmatprep.mubr.bf16.mxu1 %v2804_v53 }
  0xc3   : > { %1141 = vmatmul.mubr.bf16.gmra.mrb[20].mxu0 %v2806_v54  ;;  %1301 = vmatmul.mubr.bf16.gmra.mrb[20].mxu1 %v2807_v55 }
  0xc4   : > { %1150 = vmatprep.mubr.bf16.mxu0 %v2808_v56  ;;  %1310 = vmatprep.mubr.bf16.mxu1 %v2810_v57 }
  0xcb   : > { %1151 = vmatmul.mubr.bf16.gmra.mrb[24].mxu0 %v2812_v58  ;;  %1311 = vmatmul.mubr.bf16.gmra.mrb[24].mxu1 %v2813_v59 }
  0xcc   : > { %1160 = vmatprep.mubr.bf16.mxu0 %v2814_v60  ;;  %1320 = vmatprep.mubr.bf16.mxu1 %v2816_v61 }
  0xd3   : > { %1161 = vmatmul.mubr.bf16.gmra.mrb[28].mxu0 %v2818_v62  ;;  %1321 = vmatmul.mubr.bf16.gmra.mrb[28].mxu1 %v2819_v63 }
  0xd4   : > { %1170 = vmatprep.mubr.bf16.mxu0 %v2820_v0  ;;  %1330 = vmatprep.mubr.bf16.mxu1 %v2822_v1 }
  0xdb   : > { %1171 = vmatmul.mubr.bf16.gmra.mrb[32].mxu0 %v2824_v2  ;;  %1331 = vmatmul.mubr.bf16.gmra.mrb[32].mxu1 %v2825_v3 }
  0xdc   : > { %1180 = vmatprep.mubr.bf16.mxu0 %v2826_v4  ;;  %1340 = vmatprep.mubr.bf16.mxu1 %v2828_v5 }
  0xe3   : > { %1181 = vmatmul.mubr.bf16.gmra.mrb[36].mxu0 %v2830_v6  ;;  %1341 = vmatmul.mubr.bf16.gmra.mrb[36].mxu1 %v2831_v7 }
  0xe4   : > { %1190 = vmatprep.mubr.bf16.mxu0 %v2832_v8  ;;  %1350 = vmatprep.mubr.bf16.mxu1 %v2834_v9 }
  0xeb   : > { %1191 = vmatmul.mubr.bf16.gmra.mrb[40].mxu0 %v2836_v10  ;;  %1351 = vmatmul.mubr.bf16.gmra.mrb[40].mxu1 %v2837_v11 }
  0xec   : > { %1200 = vmatprep.mubr.bf16.mxu0 %v2838_v12  ;;  %1360 = vmatprep.mubr.bf16.mxu1 %v2840_v13 }
  0xf3   : > { %1201 = vmatmul.mubr.bf16.gmra.mrb[44].mxu0 %v2842_v14  ;;  %1361 = vmatmul.mubr.bf16.gmra.mrb[44].mxu1 %v2843_v15 }
  0xf4   : > { %1210 = vmatprep.mubr.bf16.mxu0 %v2844_v16  ;;  %1370 = vmatprep.mubr.bf16.mxu1 %v2846_v17 }
  0xfb   : > { %1211 = vmatmul.mubr.bf16.gmra.mrb[48].mxu0 %v2848_v18  ;;  %1371 = vmatmul.mubr.bf16.gmra.mrb[48].mxu1 %v2849_v19 }
  0xfc   : > { %1220 = vmatprep.mubr.bf16.mxu0 %v2850_v20  ;;  %1380 = vmatprep.mubr.bf16.mxu1 %v2852_v21 }
 0x103   : > { %1221 = vmatmul.mubr.bf16.gmra.mrb[52].mxu0 %v2854_v22  ;;  %1381 = vmatmul.mubr.bf16.gmra.mrb[52].mxu1 %v2855_v23 }
 0x104   : > { %1230 = vmatprep.mubr.bf16.mxu0 %v2856_v24  ;;  %1390 = vmatprep.mubr.bf16.mxu1 %v2858_v25 }
 0x10b   : > { %1231 = vmatmul.mubr.bf16.gmra.mrb[56].mxu0 %v2860_v26  ;;  %1391 = vmatmul.mubr.bf16.gmra.mrb[56].mxu1 %v2861_v27 }
 0x10c   : > { %1240 = vmatprep.mubr.bf16.mxu0 %v2862_v28  ;;  %1400 = vmatprep.mubr.bf16.mxu1 %v2864_v29 }
 0x113   : > { %1241 = vmatmul.mubr.bf16.gmra.mrb[60].mxu0 %v2866_v30  ;;  %1401 = vmatmul.mubr.bf16.gmra.mrb[60].mxu1 %v2867_v31 }
 0x16e   : > { %v1092_v32 = vpop.f32.mrb[0].mxu0  ;;  %v1252_v33 = vpop.f32.mrb[0].mxu1 }
 0x16f   : > { %v1094_v34 = vpop.f32.mrb[1].mxu0  ;;  %v1254_v35 = vpop.f32.mrb[1].mxu1 }
 0x170   : > { %v2548_v36 = vpack.c.bf16 %v1094_v34, %v1092_v32  ;;  %v2580_v37 = vpack.c.bf16 %v1254_v35, %v1252_v33  ;;  %v1096_v38 = vpop.f32.mrb[2].mxu0  ;;  %v1256_v39 = vpop.f32.mrb[2].mxu1 }
 0x171   : > { %v1098_v40 = vpop.f32.mrb[3].mxu0  ;;  %v1258_v41 = vpop.f32.mrb[3].mxu1 }
 0x172   : > { %2182 = vst [vmem:[%s3243_s19] sm:$0xff] %v2548_v36  ;;  %2214 = vst [vmem:[%s3243_s19 + $0x100] sm:$0xff] %v2580_v37  ;;  %v2549_v42 = vpack.c.bf16 %v1098_v40, %v1096_v38  ;;  %v2581_v43 = vpack.c.bf16 %v1258_v41, %v1256_v39 }
 0x174   : > { %2183 = vst [vmem:[%s3243_s19 + $0x8] sm:$0xff] %v2549_v42  ;;  %2215 = vst [vmem:[%s3243_s19 + $0x108] sm:$0xff] %v2581_v43 }
 0x176   : > { %v1102_v44 = vpop.f32.mrb[4].mxu0  ;;  %v1262_v45 = vpop.f32.mrb[4].mxu1 }
 0x177   : > { %v1104_v46 = vpop.f32.mrb[5].mxu0  ;;  %v1264_v47 = vpop.f32.mrb[5].mxu1 }
 0x178   : > { %v2550_v48 = vpack.c.bf16 %v1104_v46, %v1102_v44  ;;  %v2582_v49 = vpack.c.bf16 %v1264_v47, %v1262_v45  ;;  %v1106_v50 = vpop.f32.mrb[6].mxu0  ;;  %v1266_v51 = vpop.f32.mrb[6].mxu1 }
 0x179   : > { %v1108_v52 = vpop.f32.mrb[7].mxu0  ;;  %v1268_v53 = vpop.f32.mrb[7].mxu1 }
 0x17a   : > { %2184 = vst [vmem:[%s3243_s19 + $0x10] sm:$0xff] %v2550_v48  ;;  %2216 = vst [vmem:[%s3243_s19 + $0x110] sm:$0xff] %v2582_v49  ;;  %v2551_v54 = vpack.c.bf16 %v1108_v52, %v1106_v50  ;;  %v2583_v55 = vpack.c.bf16 %v1268_v53, %v1266_v51 }
 0x17c   : > { %2185 = vst [vmem:[%s3243_s19 + $0x18] sm:$0xff] %v2551_v54  ;;  %2217 = vst [vmem:[%s3243_s19 + $0x118] sm:$0xff] %v2583_v55 }
 0x17e   : > { %v1112_v56 = vpop.f32.mrb[8].mxu0  ;;  %v1272_v57 = vpop.f32.mrb[8].mxu1 }
 0x17f   : > { %v1114_v58 = vpop.f32.mrb[9].mxu0  ;;  %v1274_v59 = vpop.f32.mrb[9].mxu1 }
 0x180   : > { %v2552_v60 = vpack.c.bf16 %v1114_v58, %v1112_v56  ;;  %v2584_v61 = vpack.c.bf16 %v1274_v59, %v1272_v57  ;;  %v1116_v62 = vpop.f32.mrb[10].mxu0  ;;  %v1276_v63 = vpop.f32.mrb[10].mxu1 }
 0x181   : > { %v1118_v0 = vpop.f32.mrb[11].mxu0  ;;  %v1278_v1 = vpop.f32.mrb[11].mxu1 }
 0x182   : > { %2186 = vst [vmem:[%s3243_s19 + $0x20] sm:$0xff] %v2552_v60  ;;  %2218 = vst [vmem:[%s3243_s19 + $0x120] sm:$0xff] %v2584_v61  ;;  %v2553_v2 = vpack.c.bf16 %v1118_v0, %v1116_v62  ;;  %v2585_v3 = vpack.c.bf16 %v1278_v1, %v1276_v63 }
 0x184   : > { %2187 = vst [vmem:[%s3243_s19 + $0x28] sm:$0xff] %v2553_v2  ;;  %2219 = vst [vmem:[%s3243_s19 + $0x128] sm:$0xff] %v2585_v3 }
 0x186   : > { %v1122_v4 = vpop.f32.mrb[12].mxu0  ;;  %v1282_v5 = vpop.f32.mrb[12].mxu1 }
 0x187   : > { %v1124_v6 = vpop.f32.mrb[13].mxu0  ;;  %v1284_v7 = vpop.f32.mrb[13].mxu1 }
 0x188   : > { %v2554_v8 = vpack.c.bf16 %v1124_v6, %v1122_v4  ;;  %v2586_v9 = vpack.c.bf16 %v1284_v7, %v1282_v5  ;;  %v1126_v10 = vpop.f32.mrb[14].mxu0  ;;  %v1286_v11 = vpop.f32.mrb[14].mxu1 }
 0x189   : > { %v1128_v12 = vpop.f32.mrb[15].mxu0  ;;  %v1288_v13 = vpop.f32.mrb[15].mxu1 }
 0x18a   : > { %2188 = vst [vmem:[%s3243_s19 + $0x30] sm:$0xff] %v2554_v8  ;;  %2220 = vst [vmem:[%s3243_s19 + $0x130] sm:$0xff] %v2586_v9  ;;  %v2555_v14 = vpack.c.bf16 %v1128_v12, %v1126_v10  ;;  %v2587_v15 = vpack.c.bf16 %v1288_v13, %v1286_v11 }
 0x18c   : > { %2189 = vst [vmem:[%s3243_s19 + $0x38] sm:$0xff] %v2555_v14  ;;  %2221 = vst [vmem:[%s3243_s19 + $0x138] sm:$0xff] %v2587_v15 }
 0x18e   : > { %v1132_v16 = vpop.f32.mrb[16].mxu0  ;;  %v1292_v17 = vpop.f32.mrb[16].mxu1 }
 0x18f   : > { %v1134_v18 = vpop.f32.mrb[17].mxu0  ;;  %v1294_v19 = vpop.f32.mrb[17].mxu1 }
 0x190   : > { %v2556_v20 = vpack.c.bf16 %v1134_v18, %v1132_v16  ;;  %v2588_v21 = vpack.c.bf16 %v1294_v19, %v1292_v17  ;;  %v1136_v22 = vpop.f32.mrb[18].mxu0  ;;  %v1296_v23 = vpop.f32.mrb[18].mxu1 }
 0x191   : > { %v1138_v24 = vpop.f32.mrb[19].mxu0  ;;  %v1298_v25 = vpop.f32.mrb[19].mxu1 }
 0x192   : > { %2190 = vst [vmem:[%s3243_s19 + $0x40] sm:$0xff] %v2556_v20  ;;  %2222 = vst [vmem:[%s3243_s19 + $0x140] sm:$0xff] %v2588_v21  ;;  %v2557_v26 = vpack.c.bf16 %v1138_v24, %v1136_v22  ;;  %v2589_v27 = vpack.c.bf16 %v1298_v25, %v1296_v23 }
 0x194   : > { %2191 = vst [vmem:[%s3243_s19 + $0x48] sm:$0xff] %v2557_v26  ;;  %2223 = vst [vmem:[%s3243_s19 + $0x148] sm:$0xff] %v2589_v27 }
 0x196   : > { %v1142_v28 = vpop.f32.mrb[20].mxu0  ;;  %v1302_v29 = vpop.f32.mrb[20].mxu1 }
 0x197   : > { %v1144_v30 = vpop.f32.mrb[21].mxu0  ;;  %v1304_v31 = vpop.f32.mrb[21].mxu1 }
 0x198   : > { %v2558_v32 = vpack.c.bf16 %v1144_v30, %v1142_v28  ;;  %v2590_v33 = vpack.c.bf16 %v1304_v31, %v1302_v29  ;;  %v1146_v34 = vpop.f32.mrb[22].mxu0  ;;  %v1306_v35 = vpop.f32.mrb[22].mxu1 }
 0x199   : > { %v1148_v36 = vpop.f32.mrb[23].mxu0  ;;  %v1308_v37 = vpop.f32.mrb[23].mxu1 }
 0x19a   : > { %2192 = vst [vmem:[%s3243_s19 + $0x50] sm:$0xff] %v2558_v32  ;;  %2224 = vst [vmem:[%s3243_s19 + $0x150] sm:$0xff] %v2590_v33  ;;  %v2559_v38 = vpack.c.bf16 %v1148_v36, %v1146_v34  ;;  %v2591_v39 = vpack.c.bf16 %v1308_v37, %v1306_v35 }
 0x19c   : > { %2193 = vst [vmem:[%s3243_s19 + $0x58] sm:$0xff] %v2559_v38  ;;  %2225 = vst [vmem:[%s3243_s19 + $0x158] sm:$0xff] %v2591_v39 }
 0x19e   : > { %v1152_v40 = vpop.f32.mrb[24].mxu0  ;;  %v1312_v41 = vpop.f32.mrb[24].mxu1 }
 0x19f   : > { %v1154_v42 = vpop.f32.mrb[25].mxu0  ;;  %v1314_v43 = vpop.f32.mrb[25].mxu1 }
 0x1a0   : > { %v2560_v44 = vpack.c.bf16 %v1154_v42, %v1152_v40  ;;  %v2592_v45 = vpack.c.bf16 %v1314_v43, %v1312_v41  ;;  %v1156_v46 = vpop.f32.mrb[26].mxu0  ;;  %v1316_v47 = vpop.f32.mrb[26].mxu1 }
 0x1a1   : > { %v1158_v48 = vpop.f32.mrb[27].mxu0  ;;  %v1318_v49 = vpop.f32.mrb[27].mxu1 }
 0x1a2   : > { %2194 = vst [vmem:[%s3243_s19 + $0x60] sm:$0xff] %v2560_v44  ;;  %2226 = vst [vmem:[%s3243_s19 + $0x160] sm:$0xff] %v2592_v45  ;;  %v2561_v50 = vpack.c.bf16 %v1158_v48, %v1156_v46  ;;  %v2593_v51 = vpack.c.bf16 %v1318_v49, %v1316_v47 }
 0x1a4   : > { %2195 = vst [vmem:[%s3243_s19 + $0x68] sm:$0xff] %v2561_v50  ;;  %2227 = vst [vmem:[%s3243_s19 + $0x168] sm:$0xff] %v2593_v51 }
 0x1a6   : > { %v1162_v52 = vpop.f32.mrb[28].mxu0  ;;  %v1322_v53 = vpop.f32.mrb[28].mxu1 }
 0x1a7   : > { %v1164_v54 = vpop.f32.mrb[29].mxu0  ;;  %v1324_v55 = vpop.f32.mrb[29].mxu1 }
 0x1a8   : > { %v2562_v56 = vpack.c.bf16 %v1164_v54, %v1162_v52  ;;  %v2594_v57 = vpack.c.bf16 %v1324_v55, %v1322_v53  ;;  %v1166_v58 = vpop.f32.mrb[30].mxu0  ;;  %v1326_v59 = vpop.f32.mrb[30].mxu1 }
 0x1a9   : > { %v1168_v60 = vpop.f32.mrb[31].mxu0  ;;  %v1328_v61 = vpop.f32.mrb[31].mxu1 }
 0x1aa   : > { %2196 = vst [vmem:[%s3243_s19 + $0x70] sm:$0xff] %v2562_v56  ;;  %2228 = vst [vmem:[%s3243_s19 + $0x170] sm:$0xff] %v2594_v57  ;;  %v2563_v62 = vpack.c.bf16 %v1168_v60, %v1166_v58  ;;  %v2595_v63 = vpack.c.bf16 %v1328_v61, %v1326_v59 }
 0x1ac   : > { %2197 = vst [vmem:[%s3243_s19 + $0x78] sm:$0xff] %v2563_v62  ;;  %2229 = vst [vmem:[%s3243_s19 + $0x178] sm:$0xff] %v2595_v63 }
 0x1ae   : > { %v1172_v0 = vpop.f32.mrb[32].mxu0  ;;  %v1332_v1 = vpop.f32.mrb[32].mxu1 }
 0x1af   : > { %v1174_v2 = vpop.f32.mrb[33].mxu0  ;;  %v1334_v3 = vpop.f32.mrb[33].mxu1 }
 0x1b0   : > { %v2564_v4 = vpack.c.bf16 %v1174_v2, %v1172_v0  ;;  %v2596_v5 = vpack.c.bf16 %v1334_v3, %v1332_v1  ;;  %v1176_v6 = vpop.f32.mrb[34].mxu0  ;;  %v1336_v7 = vpop.f32.mrb[34].mxu1 }
 0x1b1   : > { %v1178_v8 = vpop.f32.mrb[35].mxu0  ;;  %v1338_v9 = vpop.f32.mrb[35].mxu1 }
 0x1b2   : > { %2198 = vst [vmem:[%s3243_s19 + $0x80] sm:$0xff] %v2564_v4  ;;  %2230 = vst [vmem:[%s3243_s19 + $0x180] sm:$0xff] %v2596_v5  ;;  %v2565_v10 = vpack.c.bf16 %v1178_v8, %v1176_v6  ;;  %v2597_v11 = vpack.c.bf16 %v1338_v9, %v1336_v7 }
 0x1b4   : > { %2199 = vst [vmem:[%s3243_s19 + $0x88] sm:$0xff] %v2565_v10  ;;  %2231 = vst [vmem:[%s3243_s19 + $0x188] sm:$0xff] %v2597_v11 }
 0x1b6   : > { %v1182_v12 = vpop.f32.mrb[36].mxu0  ;;  %v1342_v13 = vpop.f32.mrb[36].mxu1 }
 0x1b7   : > { %v1184_v14 = vpop.f32.mrb[37].mxu0  ;;  %v1344_v15 = vpop.f32.mrb[37].mxu1 }
 0x1b8   : > { %v2566_v16 = vpack.c.bf16 %v1184_v14, %v1182_v12  ;;  %v2598_v17 = vpack.c.bf16 %v1344_v15, %v1342_v13  ;;  %v1186_v18 = vpop.f32.mrb[38].mxu0  ;;  %v1346_v19 = vpop.f32.mrb[38].mxu1 }
 0x1b9   : > { %v1188_v20 = vpop.f32.mrb[39].mxu0  ;;  %v1348_v21 = vpop.f32.mrb[39].mxu1 }
 0x1ba   : > { %2200 = vst [vmem:[%s3243_s19 + $0x90] sm:$0xff] %v2566_v16  ;;  %2232 = vst [vmem:[%s3243_s19 + $0x190] sm:$0xff] %v2598_v17  ;;  %v2567_v22 = vpack.c.bf16 %v1188_v20, %v1186_v18  ;;  %v2599_v23 = vpack.c.bf16 %v1348_v21, %v1346_v19 }
 0x1bc   : > { %2201 = vst [vmem:[%s3243_s19 + $0x98] sm:$0xff] %v2567_v22  ;;  %2233 = vst [vmem:[%s3243_s19 + $0x198] sm:$0xff] %v2599_v23 }
 0x1be   : > { %v1192_v24 = vpop.f32.mrb[40].mxu0  ;;  %v1352_v25 = vpop.f32.mrb[40].mxu1 }
 0x1bf   : > { %v1194_v26 = vpop.f32.mrb[41].mxu0  ;;  %v1354_v27 = vpop.f32.mrb[41].mxu1 }
 0x1c0   : > { %v2568_v28 = vpack.c.bf16 %v1194_v26, %v1192_v24  ;;  %v2600_v29 = vpack.c.bf16 %v1354_v27, %v1352_v25  ;;  %v1196_v30 = vpop.f32.mrb[42].mxu0  ;;  %v1356_v31 = vpop.f32.mrb[42].mxu1 }
 0x1c1   : > { %v1198_v32 = vpop.f32.mrb[43].mxu0  ;;  %v1358_v33 = vpop.f32.mrb[43].mxu1 }
 0x1c2   : > { %2202 = vst [vmem:[%s3243_s19 + $0xa0] sm:$0xff] %v2568_v28  ;;  %2234 = vst [vmem:[%s3243_s19 + $0x1a0] sm:$0xff] %v2600_v29  ;;  %v2569_v34 = vpack.c.bf16 %v1198_v32, %v1196_v30  ;;  %v2601_v35 = vpack.c.bf16 %v1358_v33, %v1356_v31 }
 0x1c4   : > { %2203 = vst [vmem:[%s3243_s19 + $0xa8] sm:$0xff] %v2569_v34  ;;  %2235 = vst [vmem:[%s3243_s19 + $0x1a8] sm:$0xff] %v2601_v35 }
 0x1c6   : > { %v1202_v36 = vpop.f32.mrb[44].mxu0  ;;  %v1362_v37 = vpop.f32.mrb[44].mxu1 }
 0x1c7   : > { %v1204_v38 = vpop.f32.mrb[45].mxu0  ;;  %v1364_v39 = vpop.f32.mrb[45].mxu1 }
 0x1c8   : > { %v2570_v40 = vpack.c.bf16 %v1204_v38, %v1202_v36  ;;  %v2602_v41 = vpack.c.bf16 %v1364_v39, %v1362_v37  ;;  %v1206_v42 = vpop.f32.mrb[46].mxu0  ;;  %v1366_v43 = vpop.f32.mrb[46].mxu1 }
 0x1c9   : > { %v1208_v44 = vpop.f32.mrb[47].mxu0  ;;  %v1368_v45 = vpop.f32.mrb[47].mxu1 }
 0x1ca   : > { %2204 = vst [vmem:[%s3243_s19 + $0xb0] sm:$0xff] %v2570_v40  ;;  %2236 = vst [vmem:[%s3243_s19 + $0x1b0] sm:$0xff] %v2602_v41  ;;  %v2571_v46 = vpack.c.bf16 %v1208_v44, %v1206_v42  ;;  %v2603_v47 = vpack.c.bf16 %v1368_v45, %v1366_v43 }
 0x1cc   : > { %2205 = vst [vmem:[%s3243_s19 + $0xb8] sm:$0xff] %v2571_v46  ;;  %2237 = vst [vmem:[%s3243_s19 + $0x1b8] sm:$0xff] %v2603_v47 }
 0x1ce   : > { %v1212_v48 = vpop.f32.mrb[48].mxu0  ;;  %v1372_v49 = vpop.f32.mrb[48].mxu1 }
 0x1cf   : > { %v1214_v50 = vpop.f32.mrb[49].mxu0  ;;  %v1374_v51 = vpop.f32.mrb[49].mxu1 }
 0x1d0   : > { %v2572_v52 = vpack.c.bf16 %v1214_v50, %v1212_v48  ;;  %v2604_v53 = vpack.c.bf16 %v1374_v51, %v1372_v49  ;;  %v1216_v54 = vpop.f32.mrb[50].mxu0  ;;  %v1376_v55 = vpop.f32.mrb[50].mxu1 }
 0x1d1   : > { %v1218_v56 = vpop.f32.mrb[51].mxu0  ;;  %v1378_v57 = vpop.f32.mrb[51].mxu1 }
 0x1d2   : > { %2206 = vst [vmem:[%s3243_s19 + $0xc0] sm:$0xff] %v2572_v52  ;;  %2238 = vst [vmem:[%s3243_s19 + $0x1c0] sm:$0xff] %v2604_v53  ;;  %v2573_v58 = vpack.c.bf16 %v1218_v56, %v1216_v54  ;;  %v2605_v59 = vpack.c.bf16 %v1378_v57, %v1376_v55 }
 0x1d4   : > { %2207 = vst [vmem:[%s3243_s19 + $0xc8] sm:$0xff] %v2573_v58  ;;  %2239 = vst [vmem:[%s3243_s19 + $0x1c8] sm:$0xff] %v2605_v59 }
 0x1d6   : > { %v1222_v60 = vpop.f32.mrb[52].mxu0  ;;  %v1382_v61 = vpop.f32.mrb[52].mxu1 }
 0x1d7   : > { %v1224_v62 = vpop.f32.mrb[53].mxu0  ;;  %v1384_v63 = vpop.f32.mrb[53].mxu1 }
 0x1d8   : > { %v2574_v0 = vpack.c.bf16 %v1224_v62, %v1222_v60  ;;  %v2606_v1 = vpack.c.bf16 %v1384_v63, %v1382_v61  ;;  %v1226_v2 = vpop.f32.mrb[54].mxu0  ;;  %v1386_v3 = vpop.f32.mrb[54].mxu1 }
 0x1d9   : > { %v1228_v4 = vpop.f32.mrb[55].mxu0  ;;  %v1388_v5 = vpop.f32.mrb[55].mxu1 }
 0x1da   : > { %2208 = vst [vmem:[%s3243_s19 + $0xd0] sm:$0xff] %v2574_v0  ;;  %2240 = vst [vmem:[%s3243_s19 + $0x1d0] sm:$0xff] %v2606_v1  ;;  %v2575_v6 = vpack.c.bf16 %v1228_v4, %v1226_v2  ;;  %v2607_v7 = vpack.c.bf16 %v1388_v5, %v1386_v3 }
 0x1dc   : > { %2209 = vst [vmem:[%s3243_s19 + $0xd8] sm:$0xff] %v2575_v6  ;;  %2241 = vst [vmem:[%s3243_s19 + $0x1d8] sm:$0xff] %v2607_v7 }
 0x1de   : > { %v1232_v8 = vpop.f32.mrb[56].mxu0  ;;  %v1392_v9 = vpop.f32.mrb[56].mxu1 }
 0x1df   : > { %v1234_v10 = vpop.f32.mrb[57].mxu0  ;;  %v1394_v11 = vpop.f32.mrb[57].mxu1 }
 0x1e0   : > { %v2576_v12 = vpack.c.bf16 %v1234_v10, %v1232_v8  ;;  %v2608_v13 = vpack.c.bf16 %v1394_v11, %v1392_v9  ;;  %v1236_v14 = vpop.f32.mrb[58].mxu0  ;;  %v1396_v15 = vpop.f32.mrb[58].mxu1 }
 0x1e1   : > { %v1238_v16 = vpop.f32.mrb[59].mxu0  ;;  %v1398_v17 = vpop.f32.mrb[59].mxu1 }
 0x1e2   : > { %2210 = vst [vmem:[%s3243_s19 + $0xe0] sm:$0xff] %v2576_v12  ;;  %2242 = vst [vmem:[%s3243_s19 + $0x1e0] sm:$0xff] %v2608_v13  ;;  %v2577_v18 = vpack.c.bf16 %v1238_v16, %v1236_v14  ;;  %v2609_v19 = vpack.c.bf16 %v1398_v17, %v1396_v15 }
 0x1e4   : > { %2211 = vst [vmem:[%s3243_s19 + $0xe8] sm:$0xff] %v2577_v18  ;;  %2243 = vst [vmem:[%s3243_s19 + $0x1e8] sm:$0xff] %v2609_v19 }
 0x1e6   : > { %v1242_v20 = vpop.f32.mrb[60].mxu0  ;;  %v1402_v21 = vpop.f32.mrb[60].mxu1 }
 0x1e7   : > { %v1244_v22 = vpop.f32.mrb[61].mxu0  ;;  %v1404_v23 = vpop.f32.mrb[61].mxu1 }
 0x1e8   : > { %v2578_v24 = vpack.c.bf16 %v1244_v22, %v1242_v20  ;;  %v2610_v25 = vpack.c.bf16 %v1404_v23, %v1402_v21  ;;  %v1246_v26 = vpop.f32.mrb[62].mxu0  ;;  %v1406_v27 = vpop.f32.mrb[62].mxu1 }
 0x1e9   : > { %v1248_v28 = vpop.f32.mrb[63].mxu0  ;;  %v1408_v29 = vpop.f32.mrb[63].mxu1 }
 0x1ea   : > { %2212 = vst [vmem:[%s3243_s19 + $0xf0] sm:$0xff] %v2578_v24  ;;  %2244 = vst [vmem:[%s3243_s19 + $0x1f0] sm:$0xff] %v2610_v25  ;;  %v2579_v30 = vpack.c.bf16 %v1248_v28, %v1246_v26  ;;  %v2611_v31 = vpack.c.bf16 %v1408_v29, %v1406_v27 }
 0x1ec   : > { %2213 = vst [vmem:[%s3243_s19 + $0xf8] sm:$0xff] %v2579_v30  ;;  %2245 = vst [vmem:[%s3243_s19 + $0x1f8] sm:$0xff] %v2611_v31 }
 0x1ed   : > { %2939 = shalt.err (!%p2936_p8)
}
 0x1ee   : > { %s2940_s24 = scalar_lea.hbm %s3310_s6, 8192  ;;  %s2944_s26 = scalar_lea.hbm %s3367_s2, 16384 }
 0x1ef   : > { %p2941_p0 = scmp.ne.s32.totalorder %s3310_s6, %s2940_s24  ;;  %p2945_p12 = scmp.lt.u32.totalorder %s3310_s6, %s3367_s2 }
 0x1f0   : > { %p2946_p5 = scmp.lt.u32.totalorder %s2944_s26, %s2940_s24  ;;  %p2948_p9 = scmp.lt.u32.totalorder %s2940_s24, %s3310_s6 }
 0x1f1   : > { %p2942_p2 = pnand %p2941_p0, %p3386_p11 }
 0x1f2   : > { %p2947_p10 = por %p2946_p5, %p2945_p12 }
 0x1f3   : > { %p2943_p7 = pneg %p2942_p2 }
 0x1f4   : > { %p2949_p13 = por %p2948_p9, %p2947_p10 }
 0x1f6   : > { %p2950_p4 = pnand %p2949_p13, %p2943_p7 }
 0x1f8   : > { %2953 = shalt.err (!%p2950_p4)
}
 0x1f9   : > { %s3020_s17 = smov 128   ;;  %s3021_s19 = smov 256  }
 0x1fa   : > { %s3022_s22 = smov 8  }
 0x1fb   : > { %2651 = dma.vmem_to_hbm [thread:$0]  (%p3386_p11), %s3312_s8, 8192, %s3310_s6, %s2247_s12, %s3020_s17, %s3021_s19, %s3022_s22  }
 0x1fc PF: > { %s2278_s15 = sand.u32 1, %s2992_s9   ;;  %p3387_p1 = scmp.ne.s32.totalorder %s3378_s21, 0 }
 0x1fd   : > { %p3388_p3 = scmp.ge.s32.totalorder %s3012_s14, 2  ;;  %s2279_s5 = scalar_lea.sflag [#allocation5], %s2278_s15 }
 0x1ff   : > { %p2662_p6 = pnand %p3388_p3, %p3387_p1 }
 0x201   : > { %2987 = dma.done.wait (!%p2662_p6), %s2279_s5, 8192  }
 0x202   : > { %2989 = vsyncadd (!%p2662_p6), %s2279_s5, 4294959104  ;;  %s19_s14 = sadd.s32 1, %s3012_s14   ;;  %s3389_s9 = smov %s2996_s10 }
 0x203   : > { %p16_p8 = scmp.ge.s32.totalorder %s19_s14, 4   ;;  %s3390_s10 = smov %s3000_s11 }
 0x204   : > { %s3391_s11 = smov %s3159_s7  ;;  %s3392_s12 = smov %s3008_s13 }
 0x205   : > { %s3393_s13 = smov %s3395_s27  ;;  %18 = sbr.rel (!%p16_p8) target bundleno = 7 (0x7), region = 87 }
 0x20c   :  { %2284 = vsyncpa [#allocation4], 1 }
 0x20d   :  { %2286 = vsyncpa [#allocation4 + $0x1], 1 }
 0x20e   :  { %2287 = vsyncpa [#allocation7], 1 }
 0x20f   :  { %2289 = vsyncpa [#allocation7 + $0x1], 1 }
 0x210   :  { %2290 = vsyncpa [#allocation5], 1 }
 0x211   :  { %2292 = vsyncpa [#allocation5 + $0x1], 1 }

</bundles_post_ra>
